<compile_context>
chip_gen: v6e
topology: v6e:2x2x1
jax: 0.10.0
libtpu: 0.0.40
codegen_flags: <defaults>
</compile_context>

<pallas_src>
import functools

import jax
import jax.numpy as jnp
from jax import lax
from jax.experimental import pallas as pl
from jax.experimental.pallas import tpu as pltpu


def _round_up(x, m):
    return ((x + m - 1) // m) * m


def _tensorcores_per_device():
    """Best-effort count of TensorCores a 'parallel' grid axis is sharded over."""
    try:
        kind = jax.devices()[0].device_kind.lower()
    except Exception:
        return 1
    if ("v7" in kind) or ("v4" in kind) or ("v5p" in kind):
        return 2
    return 1


def _iou_loss_kernel(b_ref, o_ref, *, loss_type, fuse_reduce, n, tr):
    # b_ref: (2, 4, tr, 128) tile; axis0 = [pred, target], axis1 = [cx, cy, w, h].
    # o_ref: (tr, 128) loss tile, or (1, 8, 128) per-step partial sums.
    p_cx, p_cy, p_w, p_h = b_ref[0, 0], b_ref[0, 1], b_ref[0, 2], b_ref[0, 3]
    t_cx, t_cy, t_w, t_h = b_ref[1, 0], b_ref[1, 1], b_ref[1, 2], b_ref[1, 3]

    p_hw = p_w * 0.5
    p_hh = p_h * 0.5
    t_hw = t_w * 0.5
    t_hh = t_h * 0.5

    # Corners computed once, reused by intersection and (for giou) the
    # enclosing box.
    p_x1 = p_cx - p_hw
    p_y1 = p_cy - p_hh
    p_x2 = p_cx + p_hw
    p_y2 = p_cy + p_hh
    t_x1 = t_cx - t_hw
    t_y1 = t_cy - t_hh
    t_x2 = t_cx + t_hw
    t_y2 = t_cy + t_hh

    tl_x = jnp.maximum(p_x1, t_x1)
    tl_y = jnp.maximum(p_y1, t_y1)
    br_x = jnp.minimum(p_x2, t_x2)
    br_y = jnp.minimum(p_y2, t_y2)

    area_p = p_w * p_h
    area_g = t_w * t_h
    # max(br - tl, 0) clamps are exactly equivalent to the (tl < br) en-mask.
    area_i = jnp.maximum(br_x - tl_x, 0.0) * jnp.maximum(br_y - tl_y, 0.0)
    area_u = area_p + area_g - area_i
    iou = area_i / (area_u + 1e-16)

    if loss_type == "iou":
        loss = 1.0 - iou * iou
    else:  # "giou" (validated in the wrapper)
        c_tl_x = jnp.minimum(p_x1, t_x1)
        c_tl_y = jnp.minimum(p_y1, t_y1)
        c_br_x = jnp.maximum(p_x2, t_x2)
        c_br_y = jnp.maximum(p_y2, t_y2)
        area_c = (c_br_x - c_tl_x) * (c_br_y - c_tl_y)
        giou = iou - (area_c - area_u) / jnp.maximum(area_c, 1e-16)
        loss = 1.0 - jnp.clip(giou, -1.0, 1.0)

    if fuse_reduce:
        # Mask pad boxes (global flat index >= n) and emit an (8,128) per-lane
        # partial sum (VPU-only: reshape splits whole vregs, sum over axis 0).
        i = pl.program_id(0)
        row = lax.broadcasted_iota(jnp.int32, (tr, 128), 0)
        lane = lax.broadcasted_iota(jnp.int32, (tr, 128), 1)
        idx = (i * tr + row) * 128 + lane
        loss = jnp.where(idx < n, loss, 0.0)
        o_ref[...] = loss.reshape(tr // 8, 8, 128).sum(axis=0).reshape(1, 8, 128)
    else:
        o_ref[...] = loss


def iou_loss(pred, target, reduction="none", loss_type="iou", block_rows=1024):
    """Pallas implementation of IOUloss.forward (cxcywh boxes)."""
    if loss_type not in ("iou", "giou"):
        raise ValueError(f"unknown loss_type: {loss_type}")
    if reduction not in ("none", "mean", "sum"):
        raise ValueError(f"unknown reduction: {reduction}")

    pred = jnp.asarray(pred, jnp.float32).reshape(-1, 4)
    target = jnp.asarray(target, jnp.float32).reshape(-1, 4)
    assert pred.shape[0] == target.shape[0]
    n = pred.shape[0]

    # Rows of 128 lanes needed to hold all boxes; tile/grid sizing.
    r_needed = pl.cdiv(max(n, 1), 128)
    ncores = _tensorcores_per_device()
    grid = pl.cdiv(r_needed, block_rows)
    if ncores > 1:
        # Balanced, core-count-aligned grid so both TensorCores get equal work.
        grid = _round_up(grid, ncores)
    tr = max(8, min(block_rows, _round_up(pl.cdiv(r_needed, grid), 8)))
    r_total = grid * tr
    n_pad = r_total * 128

    # Single fused pad+transpose layout pass over BOTH box arrays ->
    # component-major planes (2, 4, R, 128).
    # TODO(synk): if the producer can emit component-major (4, N) boxes, this
    # wrapper layout pass (the only extra HBM traffic) disappears entirely.
    boxes = jnp.stack([pred, target], axis=0)                    # (2, n, 4)
    boxes = jnp.pad(boxes, ((0, 0), (0, n_pad - n), (0, 0)))     # (2, n_pad, 4)
    boxes = boxes.transpose(0, 2, 1).reshape(2, 4, r_total, 128)

    fuse_reduce = reduction in ("mean", "sum")
    if fuse_reduce:
        out_shape = jax.ShapeDtypeStruct((grid, 8, 128), jnp.float32)
        out_spec = pl.BlockSpec((1, 8, 128), lambda i: (i, 0, 0))
    else:
        out_shape = jax.ShapeDtypeStruct((r_total, 128), jnp.float32)
        out_spec = pl.BlockSpec((tr, 128), lambda i: (i, 0))

    out = pl.pallas_call(
        functools.partial(_iou_loss_kernel, loss_type=loss_type,
                          fuse_reduce=fuse_reduce, n=n, tr=tr),
        out_shape=out_shape,
        grid_spec=pltpu.PrefetchScalarGridSpec(
            num_scalar_prefetch=0,
            grid=(grid,),
            in_specs=[pl.BlockSpec((2, 4, tr, 128), lambda i: (0, 0, i, 0))],
            out_specs=out_spec,
        ),
        compiler_params=pltpu.CompilerParams(
            dimension_semantics=("parallel",),
            vmem_limit_bytes=32 * 1024 * 1024),
    )(boxes)

    if fuse_reduce:
        total = out.sum()
        if reduction == "mean":
            return total / jnp.float32(n)   # n == 0 -> NaN, matching torch
        return total
    return out.reshape(-1)[:n]


def _iou_loss_ref(pred, target, reduction="none", loss_type="iou"):
    """Pure-JAX reference mirroring the PyTorch forward."""
    pred = jnp.asarray(pred, jnp.float32).reshape(-1, 4)
    target = jnp.asarray(target, jnp.float32).reshape(-1, 4)
    tl = jnp.maximum(pred[:, :2] - pred[:, 2:] / 2, target[:, :2] - target[:, 2:] / 2)
    br = jnp.minimum(pred[:, :2] + pred[:, 2:] / 2, target[:, :2] + target[:, 2:] / 2)
    area_p = jnp.prod(pred[:, 2:], 1)
    area_g = jnp.prod(target[:, 2:], 1)
    en = jnp.prod((tl < br).astype(tl.dtype), axis=1)
    area_i = jnp.prod(br - tl, 1) * en
    area_u = area_p + area_g - area_i
    iou = area_i / (area_u + 1e-16)
    if loss_type == "iou":
        loss = 1 - iou ** 2
    else:
        c_tl = jnp.minimum(pred[:, :2] - pred[:, 2:] / 2, target[:, :2] - target[:, 2:] / 2)
        c_br = jnp.maximum(pred[:, :2] + pred[:, 2:] / 2, target[:, :2] + target[:, 2:] / 2)
        area_c = jnp.prod(c_br - c_tl, 1)
        giou = iou - (area_c - area_u) / jnp.maximum(area_c, 1e-16)
        loss = 1 - jnp.clip(giou, -1.0, 1.0)
    if reduction == "mean":
        loss = loss.mean()
    elif reduction == "sum":
        loss = loss.sum()
    return loss


def _make_boxes(key, n):
    k1, k2 = jax.random.split(key)
    return jnp.concatenate(
        [jax.random.uniform(k1, (n, 2)) * 16.0,
         jax.random.uniform(k2, (n, 2)) * 8.0 + 1.0], axis=1)


if __name__ == "__main__":
    key = jax.random.PRNGKey(0)
    k1, k2, k3, k4 = jax.random.split(key, 4)

    # small case: 8 boxes, cxcywh, positive widths/heights
    n = 8
    pred = _make_boxes(k1, n)
    target = _make_boxes(k2, n)

    out = iou_loss(pred, target, reduction="none", loss_type="iou")
    jax.block_until_ready(out)
    ref = _iou_loss_ref(pred, target, reduction="none", loss_type="iou")
    assert out.shape == ref.shape == (n,)
    assert jnp.allclose(out, ref, atol=1e-5, rtol=1e-5), (out, ref)

    # giou + fused mean reduction path
    out_g = iou_loss(pred, target, reduction="mean", loss_type="giou")
    ref_g = _iou_loss_ref(pred, target, reduction="mean", loss_type="giou")
    jax.block_until_ready(out_g)
    assert jnp.allclose(out_g, ref_g, atol=1e-5, rtol=1e-5), (out_g, ref_g)

    # moderate case: fused sum reduction with pad-box masking in the last tile
    n2 = 3000
    pred2 = _make_boxes(k3, n2)
    target2 = _make_boxes(k4, n2)
    out2 = iou_loss(pred2, target2, reduction="sum", loss_type="iou")
    ref2 = _iou_loss_ref(pred2, target2, reduction="sum", loss_type="iou")
    jax.block_until_ready(out2)
    assert jnp.allclose(out2, ref2, atol=1e-3, rtol=1e-5), (out2, ref2)

    # small-tile run to exercise a multi-step grid (masking across tiles)
    out3 = iou_loss(pred2, target2, reduction="sum", loss_type="giou", block_rows=8)
    ref3 = _iou_loss_ref(pred2, target2, reduction="sum", loss_type="giou")
    jax.block_until_ready(out3)
    assert jnp.allclose(out3, ref3, atol=1e-3, rtol=1e-5), (out3, ref3)

    out4 = iou_loss(pred2, target2, reduction="none", loss_type="giou", block_rows=8)
    ref4 = _iou_loss_ref(pred2, target2, reduction="none", loss_type="giou")
    jax.block_until_ready(out4)
    assert out4.shape == ref4.shape == (n2,)
    assert jnp.allclose(out4, ref4, atol=1e-5, rtol=1e-5)

    print("KERNEL_OK")
</pallas_src>

<mosaic_0001>
module attributes {stable_mosaic.version = 11 : i64} {
  func.func @_iou_loss_kernel(%arg0: i32, %arg1: memref<2x4x8x128xf32, #tpu.memory_space<vmem>>, %arg2: memref<8x128xf32, #tpu.memory_space<vmem>>) attributes {dimension_semantics = [#tpu.dimension_semantics<parallel>], iteration_bounds = array<i64: 1>, scalar_prefetch = 0 : i64, scratch_operands = 0 : i64, tpu.core_type = #tpu.core_type<tc>, window_params = [{transform_indices = @transform_0, window_bounds = array<i64: 2, 4, 8, 128>}, {transform_indices = @transform_1, window_bounds = array<i64: 8, 128>}]} {
    %c0 = arith.constant 0 : index
    %c0_0 = arith.constant 0 : index
    %c0_1 = arith.constant 0 : index
    %c0_2 = arith.constant 0 : index
    %0 = vector.load %arg1[%c0, %c0_0, %c0_1, %c0_2] : memref<2x4x8x128xf32, #tpu.memory_space<vmem>>, vector<1x1x8x128xf32>
    %1 = vector.shape_cast %0 : vector<1x1x8x128xf32> to vector<8x128xf32>
    %c0_3 = arith.constant 0 : index
    %c1 = arith.constant 1 : index
    %c0_4 = arith.constant 0 : index
    %c0_5 = arith.constant 0 : index
    %2 = vector.load %arg1[%c0_3, %c1, %c0_4, %c0_5] : memref<2x4x8x128xf32, #tpu.memory_space<vmem>>, vector<1x1x8x128xf32>
    %3 = vector.shape_cast %2 : vector<1x1x8x128xf32> to vector<8x128xf32>
    %c0_6 = arith.constant 0 : index
    %c2 = arith.constant 2 : index
    %c0_7 = arith.constant 0 : index
    %c0_8 = arith.constant 0 : index
    %4 = vector.load %arg1[%c0_6, %c2, %c0_7, %c0_8] : memref<2x4x8x128xf32, #tpu.memory_space<vmem>>, vector<1x1x8x128xf32>
    %5 = vector.shape_cast %4 : vector<1x1x8x128xf32> to vector<8x128xf32>
    %c0_9 = arith.constant 0 : index
    %c3 = arith.constant 3 : index
    %c0_10 = arith.constant 0 : index
    %c0_11 = arith.constant 0 : index
    %6 = vector.load %arg1[%c0_9, %c3, %c0_10, %c0_11] : memref<2x4x8x128xf32, #tpu.memory_space<vmem>>, vector<1x1x8x128xf32>
    %7 = vector.shape_cast %6 : vector<1x1x8x128xf32> to vector<8x128xf32>
    %c1_12 = arith.constant 1 : index
    %c0_13 = arith.constant 0 : index
    %c0_14 = arith.constant 0 : index
    %c0_15 = arith.constant 0 : index
    %8 = vector.load %arg1[%c1_12, %c0_13, %c0_14, %c0_15] : memref<2x4x8x128xf32, #tpu.memory_space<vmem>>, vector<1x1x8x128xf32>
    %9 = vector.shape_cast %8 : vector<1x1x8x128xf32> to vector<8x128xf32>
    %c1_16 = arith.constant 1 : index
    %c1_17 = arith.constant 1 : index
    %c0_18 = arith.constant 0 : index
    %c0_19 = arith.constant 0 : index
    %10 = vector.load %arg1[%c1_16, %c1_17, %c0_18, %c0_19] : memref<2x4x8x128xf32, #tpu.memory_space<vmem>>, vector<1x1x8x128xf32>
    %11 = vector.shape_cast %10 : vector<1x1x8x128xf32> to vector<8x128xf32>
    %c1_20 = arith.constant 1 : index
    %c2_21 = arith.constant 2 : index
    %c0_22 = arith.constant 0 : index
    %c0_23 = arith.constant 0 : index
    %12 = vector.load %arg1[%c1_20, %c2_21, %c0_22, %c0_23] : memref<2x4x8x128xf32, #tpu.memory_space<vmem>>, vector<1x1x8x128xf32>
    %13 = vector.shape_cast %12 : vector<1x1x8x128xf32> to vector<8x128xf32>
    %c1_24 = arith.constant 1 : index
    %c3_25 = arith.constant 3 : index
    %c0_26 = arith.constant 0 : index
    %c0_27 = arith.constant 0 : index
    %14 = vector.load %arg1[%c1_24, %c3_25, %c0_26, %c0_27] : memref<2x4x8x128xf32, #tpu.memory_space<vmem>>, vector<1x1x8x128xf32>
    %15 = vector.shape_cast %14 : vector<1x1x8x128xf32> to vector<8x128xf32>
    %cst = arith.constant 5.000000e-01 : f32
    %16 = vector.broadcast %cst : f32 to vector<8x128xf32>
    %17 = arith.mulf %5, %16 : vector<8x128xf32>
    %cst_28 = arith.constant 5.000000e-01 : f32
    %18 = vector.broadcast %cst_28 : f32 to vector<8x128xf32>
    %19 = arith.mulf %7, %18 : vector<8x128xf32>
    %cst_29 = arith.constant 5.000000e-01 : f32
    %20 = vector.broadcast %cst_29 : f32 to vector<8x128xf32>
    %21 = arith.mulf %13, %20 : vector<8x128xf32>
    %cst_30 = arith.constant 5.000000e-01 : f32
    %22 = vector.broadcast %cst_30 : f32 to vector<8x128xf32>
    %23 = arith.mulf %15, %22 : vector<8x128xf32>
    %24 = arith.subf %1, %17 : vector<8x128xf32>
    %25 = arith.subf %3, %19 : vector<8x128xf32>
    %26 = arith.addf %1, %17 : vector<8x128xf32>
    %27 = arith.addf %3, %19 : vector<8x128xf32>
    %28 = arith.subf %9, %21 : vector<8x128xf32>
    %29 = arith.subf %11, %23 : vector<8x128xf32>
    %30 = arith.addf %9, %21 : vector<8x128xf32>
    %31 = arith.addf %11, %23 : vector<8x128xf32>
    %32 = arith.maximumf %24, %28 : vector<8x128xf32>
    %33 = arith.maximumf %25, %29 : vector<8x128xf32>
    %34 = arith.minimumf %26, %30 : vector<8x128xf32>
    %35 = arith.minimumf %27, %31 : vector<8x128xf32>
    %36 = arith.mulf %5, %7 : vector<8x128xf32>
    %37 = arith.mulf %13, %15 : vector<8x128xf32>
    %38 = arith.subf %34, %32 : vector<8x128xf32>
    %cst_31 = arith.constant 0.000000e+00 : f32
    %39 = vector.broadcast %cst_31 : f32 to vector<8x128xf32>
    %40 = arith.maximumf %38, %39 : vector<8x128xf32>
    %41 = arith.subf %35, %33 : vector<8x128xf32>
    %cst_32 = arith.constant 0.000000e+00 : f32
    %42 = vector.broadcast %cst_32 : f32 to vector<8x128xf32>
    %43 = arith.maximumf %41, %42 : vector<8x128xf32>
    %44 = arith.mulf %40, %43 : vector<8x128xf32>
    %45 = arith.addf %36, %37 : vector<8x128xf32>
    %46 = arith.subf %45, %44 : vector<8x128xf32>
    %cst_33 = arith.constant 1.000000e-16 : f32
    %47 = vector.broadcast %cst_33 : f32 to vector<8x128xf32>
    %48 = arith.addf %46, %47 : vector<8x128xf32>
    %49 = arith.divf %44, %48 : vector<8x128xf32>
    %50 = arith.mulf %49, %49 : vector<8x128xf32>
    %cst_34 = arith.constant 1.000000e+00 : f32
    %51 = vector.broadcast %cst_34 : f32 to vector<8x128xf32>
    %52 = arith.subf %51, %50 : vector<8x128xf32>
    %c0_35 = arith.constant 0 : index
    %c0_36 = arith.constant 0 : index
    %53 = vector.load %arg2[%c0_35, %c0_36] : memref<8x128xf32, #tpu.memory_space<vmem>>, vector<8x128xf32>
    tpu.vector_store %arg2[%c0_35, %c0_36], %52 {strides = array<i32>} : memref<8x128xf32, #tpu.memory_space<vmem>>, vector<8x128xf32>,
    return
  }
  func.func @transform_0(%arg0: i32) -> (i32, i32, i32, i32) {
    %c0_i32 = arith.constant 0 : i32
    %c0_i32_0 = arith.constant 0 : i32
    %c0_i32_1 = arith.constant 0 : i32
    %c0_i32_2 = arith.constant 0 : i32
    return %c0_i32, %c0_i32_0, %arg0, %c0_i32_1 : i32, i32, i32, i32
  }
  func.func @transform_1(%arg0: i32) -> (i32, i32) {
    %c0_i32 = arith.constant 0 : i32
    %c0_i32_0 = arith.constant 0 : i32
    return %arg0, %c0_i32 : i32, i32
  }
}

</mosaic_0001>

<bundles_post_ra>
// kernel: tpu_custom_call.1
= control target key start
LH: loop header
LB: loop body
LE: loop exit
PB: predicated region body
PF: predicated region fallthrough
CT: control target
= control target key end

     0   :  { %6 = vsyncpa [#allocation3], 0  ;;  %s154_s0 = inlined_call_operand.hbm [shape: f32[2,4,8,128], index: 0, kind: input, shape index: {}]   ;;  %s155_s1 = inlined_call_operand.hbm [shape: f32[8,128], index: 1, kind: output, shape index: {}]  }
   0x1   :  { %7 = vsyncpa [#allocation4], 0  ;;  %s134_s6 = smov [#allocation2]  }
   0x2   :  { %s13_s7 = sshll.u32 %s134_s6, 4  ;;  %s14_s7 = int_to_ptr.vmem [resolvable:$true] %s13_s7 }
   0x3   :  { %s98_s8 = scalar_lea.vmem %s14_s7, 1024  ;;  %p103_p1 = scmp.lt.s32.totalorder %s14_s7, %s14_s7 }
   0x4   :  { %p99_p0 = scmp.ne.s32.totalorder %s14_s7, %s98_s8  ;;  %p104_p2 = scmp.lt.s32.totalorder %s98_s8, %s98_s8 }
   0x6   :  { %p105_p3 = por %p104_p2, %p103_p1 }
   0x8   :  { %p106_p4 = pnand %p105_p3, %p99_p0 }
   0xa   :  { %109 = shalt.err (!%p106_p4)
}
   0xb   :  { %s135_s9 = smov 128   ;;  %s136_s10 = smov 8  }
   0xc   :  { %19 = dma.hbm_to_vmem [thread:$0]  %s154_s0, 1024, %s14_s7, [#allocation3], %s135_s9, %s135_s9, %s136_s10  }
   0xd   :  { %130 = dma.done.wait [#allocation3], 1024  }
   0xe   :  { %131 = vsyncadd [#allocation3], 4294966272  ;;  %v23_v0 = vld [vmem:[#allocation2] sm:$0xff]  ;;  %v27_v1 = vld [vmem:[#allocation2 + $0x10] sm:$0xff]  ;;  %s137_s0 = smov [#allocation5]  }
   0xf   :  { %v25_v2 = vld [vmem:[#allocation2 + $0x8] sm:$0xff]  ;;  %v29_v3 = vld [vmem:[#allocation2 + $0x18] sm:$0xff]  ;;  %v31_v4 = vld [vmem:[#allocation2 + $0x20] sm:$0xff]  ;;  %v38_v5 = vmul.f32 0.5, %v27_v1  ;;  %s75_s13 = sshll.u32 %s137_s0, 4  ;;  %s76_s13 = int_to_ptr.vmem [resolvable:$true] %s75_s13 }
  0x10   :  { %v33_v6 = vld [vmem:[#allocation2 + $0x28] sm:$0xff]  ;;  %v35_v7 = vld [vmem:[#allocation2 + $0x30] sm:$0xff]  ;;  %v37_v8 = vld [vmem:[#allocation2 + $0x38] sm:$0xff]  ;;  %v39_v9 = vmul.f32 0.5, %v29_v3  ;;  %v54_v20 = vmul.f32 %v29_v3, %v27_v1  ;;  %s110_s14 = scalar_lea.vmem %s76_s13, 128  ;;  %p115_p6 = scmp.lt.s32.totalorder %s76_s13, %s76_s13 }
  0x11   :  { %v40_v10 = vmul.f32 0.5, %v35_v7  ;;  %v41_v11 = vmul.f32 0.5, %v37_v8  ;;  %v42_v12 = vsub.f32 %v23_v0, %v38_v5  ;;  %v44_v13 = vadd.f32 %v38_v5, %v23_v0  ;;  %p111_p5 = scmp.ne.s32.totalorder %s76_s13, %s110_s14  ;;  %p116_p7 = scmp.lt.s32.totalorder %s110_s14, %s110_s14 }
  0x12   :  { %v43_v14 = vsub.f32 %v25_v2, %v39_v9  ;;  %v45_v15 = vadd.f32 %v39_v9, %v25_v2  ;;  %v55_v21 = vmul.f32 %v37_v8, %v35_v7 }
  0x13   :  { %v46_v16 = vsub.f32 %v31_v4, %v40_v10  ;;  %v47_v17 = vsub.f32 %v33_v6, %v41_v11  ;;  %v48_v18 = vadd.f32 %v40_v10, %v31_v4  ;;  %v49_v19 = vadd.f32 %v41_v11, %v33_v6  ;;  %p117_p8 = por %p116_p7, %p115_p6 }
  0x14   :  { %v61_v30 = vadd.f32 %v55_v21, %v54_v20 }
  0x15   :  { %v50_v22 = vmax.f32 %v42_v12, %v46_v16  ;;  %v51_v23 = vmax.f32 %v43_v14, %v47_v17  ;;  %v52_v24 = vmin.f32 %v44_v13, %v48_v18  ;;  %v53_v25 = vmin.f32 %v45_v15, %v49_v19  ;;  %p118_p9 = pnand %p117_p8, %p111_p5 }
  0x17   :  { %v56_v26 = vsub.f32 %v52_v24, %v50_v22  ;;  %v58_v27 = vsub.f32 %v53_v25, %v51_v23 }
  0x19   :  { %v57_v28 = vmax.f32 %v56_v26, 0.0  ;;  %v59_v29 = vmax.f32 %v58_v27, 0.0 }
  0x1b   :  { %v60_v31 = vmul.f32 %v59_v29, %v57_v28 }
  0x1d   :  { %v62_v32 = vsub.f32 %v61_v30, %v60_v31 }
  0x1f   :  { %v63_v33 = vadd.f32 1e-16, %v62_v32 }
  0x21   :  { %88 = vrcp.f32 %v63_v33 }
  0x2e   :  { %v89_v34 = vpop.eup %88 }
  0x2f   :  { %v65_v35 = vmul.f32 %v89_v34, %v60_v31 }
  0x31   :  { %v66_v36 = vmul.f32 %v65_v35, %v65_v35 }
  0x33   :  { %v67_v37 = vsub.f32 1.0, %v66_v36 }
  0x35   :  { %68 = vst [vmem:[#allocation5] sm:$0xff] %v67_v37 }
  0x36   :  { %121 = shalt.err (!%p118_p9)
}
  0x37   :  { %78 = dma.vmem_to_hbm [thread:$0]  %s76_s13, 128, %s155_s1, [#allocation4]  }
  0x38   :  { %132 = dma.done.wait [#allocation4], 128  }
  0x39   :  { %133 = vsyncadd [#allocation4], 4294967168 }
  0x3a   :  { %82 = vsyncpa [#allocation3], 1 }
  0x3b   :  { %83 = vsyncpa [#allocation4], 1 }

</bundles_post_ra>
